<compile_context>
chip_gen: v5e
topology: v5e:2x2
jax: 0.10.0
libtpu: 0.0.40
codegen_flags: <defaults>
</compile_context>

<pallas_src>
import functools

import jax
import jax.numpy as jnp
from jax.experimental import pallas as pl
from jax.experimental.pallas import tpu as pltpu

INPUT_SIZE = 10          # len(feature_cols)
HIDDEN_SIZE = 64
NUM_HIDDEN_LAYERS = 3    # fc2, fc3, fc4
DEFAULT_BATCH_TILE = 8192
LANE = 128


def _round_up(n, m):
    return ((n + m - 1) // m) * m


def solarnet_kernel(xT_ref, w1_ref, b1_ref, wh_ref, bh_ref, w5_ref, b5_ref,
                    o_ref, *, compute_dtype):
    # Batch-on-lanes layout: features / hidden units on sublanes, batch on lanes.
    x = xT_ref[...]                                              # (F, bt) bf16

    # fc1 (MXU: bf16 operands, f32 accumulate)
    h = jnp.dot(w1_ref[...], x, preferred_element_type=jnp.float32)   # (H, bt)
    h = jnp.maximum(h + b1_ref[...], 0.0)

    # fc2..fc4 (packed weights, statically unrolled)
    for l in range(NUM_HIDDEN_LAYERS):
        h = jnp.dot(wh_ref[l], h.astype(compute_dtype),
                    preferred_element_type=jnp.float32)
        h = jnp.maximum(h + bh_ref[l], 0.0)

    # fc5: M = 1, so keep it off the MXU -> VPU multiply + sublane reduction.
    out = jnp.sum(w5_ref[...] * h, axis=0, keepdims=True) + b5_ref[...]   # (1, bt)
    o_ref[...] = out[None].astype(o_ref.dtype)                   # (1, 1, bt)


def solarnet_forward(x, params, *, batch_tile=DEFAULT_BATCH_TILE,
                     compute_dtype=jnp.bfloat16):
    """x: (B, INPUT_SIZE) f32.  params: PyTorch-oriented weights (see init_params).
    Returns (B, 1) f32."""
    B, F = x.shape
    assert F == INPUT_SIZE

    # --- adaptive batch tiling -------------------------------------------------
    b_padded = _round_up(B, LANE)
    bt = min(_round_up(batch_tile, LANE), b_padded)
    num_tiles = pl.cdiv(b_padded, bt)
    if b_padded > LANE:
        # At least 2 tiles so a 2-TensorCore chip (v7x) can shard the batch axis.
        num_tiles = max(num_tiles, 2)
    bt = _round_up(pl.cdiv(b_padded, num_tiles), LANE)   # balance tile sizes
    num_tiles = pl.cdiv(b_padded, bt)
    Bp = num_tiles * bt

    # --- input prep: ONE fused pad + transpose + bf16 cast ---------------------
    if Bp != B:
        x = jnp.pad(x, ((0, Bp - B), (0, 0)))
    xT = x.T.astype(compute_dtype)                               # (F, Bp) bf16

    w1 = params["w1"].astype(compute_dtype)                      # (H, F)
    wh = params["wh"].astype(compute_dtype)                      # (3, H, H)
    w5 = params["w5"].T.astype(jnp.float32)                      # (H, 1) column (VPU path)
    b1, bh, b5 = params["b1"], params["bh"], params["b5"]        # f32 columns

    rep2 = lambda i: (0, 0)
    rep3 = lambda i: (0, 0, 0)

    out3 = pl.pallas_call(
        functools.partial(solarnet_kernel, compute_dtype=compute_dtype),
        out_shape=jax.ShapeDtypeStruct((num_tiles, 1, bt), jnp.float32),
        grid=(num_tiles,),
        in_specs=[
            pl.BlockSpec((F, bt), lambda i: (0, i)),             # x^T tile (bf16)
            pl.BlockSpec(w1.shape, rep2),
            pl.BlockSpec(b1.shape, rep2),
            pl.BlockSpec(wh.shape, rep3),
            pl.BlockSpec(bh.shape, rep3),
            pl.BlockSpec(w5.shape, rep2),
            pl.BlockSpec(b5.shape, rep2),
        ],
        out_specs=pl.BlockSpec((1, 1, bt), lambda i: (i, 0, 0)),
        compiler_params=pltpu.CompilerParams(
            dimension_semantics=("parallel",)),
    )(xT, w1, b1, wh, bh, w5, b5)

    return out3.reshape(Bp, 1)[:B]


def init_params(key, input_size=INPUT_SIZE, hidden_size=HIDDEN_SIZE):
    """nn.Linear-style init: U(-1/sqrt(fan_in), 1/sqrt(fan_in)).
    Weights in PyTorch (out_features, in_features) orientation; biases as columns.
    Hidden layers fc2..fc4 packed into wh/bh."""
    def linear(k, fan_in, fan_out):
        kw, kb = jax.random.split(k)
        bound = 1.0 / (fan_in ** 0.5)
        w = jax.random.uniform(kw, (fan_out, fan_in), jnp.float32, -bound, bound)
        b = jax.random.uniform(kb, (fan_out, 1), jnp.float32, -bound, bound)
        return w, b

    k1, k2, k3, k4, k5 = jax.random.split(key, 5)
    w1, b1 = linear(k1, input_size, hidden_size)
    w2, b2 = linear(k2, hidden_size, hidden_size)
    w3, b3 = linear(k3, hidden_size, hidden_size)
    w4, b4 = linear(k4, hidden_size, hidden_size)
    w5, b5 = linear(k5, hidden_size, 1)
    return {
        "w1": w1, "b1": b1,
        "wh": jnp.stack([w2, w3, w4]), "bh": jnp.stack([b2, b3, b4]),
        "w5": w5, "b5": b5,
    }


def reference_forward(x, params, compute_dtype=jnp.bfloat16):
    """Pure-JAX reference with the same precision policy as the kernel:
    bf16 matmul operands / f32 accumulate for fc1..fc4, f32 for fc5."""
    def hidden(h, w, b):
        y = jnp.dot(h.astype(compute_dtype), w.T.astype(compute_dtype),
                    preferred_element_type=jnp.float32) + b[:, 0]
        return jnp.maximum(y, 0.0)

    h = hidden(x, params["w1"], params["b1"])
    for l in range(NUM_HIDDEN_LAYERS):
        h = hidden(h, params["wh"][l], params["bh"][l])
    return jnp.dot(h, params["w5"].T) + params["b5"][:, 0]        # fc5 in f32


if __name__ == "__main__":
    key = jax.random.PRNGKey(0)
    key, kx, kx2 = jax.random.split(key, 3)
    params = init_params(key)

    fwd = jax.jit(lambda xi: solarnet_forward(xi, params))

    # Small batch (single-tile path, padded 16 -> 128).
    B = 16
    x = jax.random.normal(kx, (B, INPUT_SIZE), jnp.float32)
    out = jax.block_until_ready(fwd(x))
    ref = reference_forward(x, params)
    assert out.shape == (B, 1)
    assert jnp.allclose(out, ref, atol=1e-3, rtol=1e-3), "mismatch vs reference (small)"

    # Larger, non-multiple batch (multi-tile grid + padding path, exercises the
    # >=2-tile rule: 3000 -> 2 tiles of 1536).
    B2 = 3000
    x2 = jax.random.normal(kx2, (B2, INPUT_SIZE), jnp.float32)
    out2 = jax.block_until_ready(fwd(x2))
    ref2 = reference_forward(x2, params)
    assert out2.shape == (B2, 1)
    assert jnp.allclose(out2, ref2, atol=1e-3, rtol=1e-3), "mismatch vs reference (large)"

    print("KERNEL_OK")
</pallas_src>

<mosaic_0001>
module attributes {stable_mosaic.version = 11 : i64} {
  func.func @solarnet_kernel(%arg0: i32, %arg1: memref<10x128xbf16, #tpu.memory_space<vmem>>, %arg2: memref<64x10xbf16, #tpu.memory_space<vmem>>, %arg3: memref<64x1xf32, #tpu.memory_space<vmem>>, %arg4: memref<3x64x64xbf16, #tpu.memory_space<vmem>>, %arg5: memref<3x64x1xf32, #tpu.memory_space<vmem>>, %arg6: memref<64x1xf32, #tpu.memory_space<vmem>>, %arg7: memref<1x1xf32, #tpu.memory_space<vmem>>, %arg8: memref<1x1x128xf32, #tpu.memory_space<vmem>>) attributes {dimension_semantics = [#tpu.dimension_semantics<parallel>], iteration_bounds = array<i64: 1>, scalar_prefetch = 0 : i64, scratch_operands = 0 : i64, tpu.core_type = #tpu.core_type<tc>, window_params = [{transform_indices = @transform_0, window_bounds = array<i64: 10, 128>}, {pipeline_mode = #tpu.pipeline_mode<synchronous>, transform_indices = @transform_1, window_bounds = array<i64: 64, 10>}, {pipeline_mode = #tpu.pipeline_mode<synchronous>, transform_indices = @transform_2, window_bounds = array<i64: 64, 1>}, {pipeline_mode = #tpu.pipeline_mode<synchronous>, transform_indices = @transform_3, window_bounds = array<i64: 3, 64, 64>}, {pipeline_mode = #tpu.pipeline_mode<synchronous>, transform_indices = @transform_4, window_bounds = array<i64: 3, 64, 1>}, {pipeline_mode = #tpu.pipeline_mode<synchronous>, transform_indices = @transform_5, window_bounds = array<i64: 64, 1>}, {pipeline_mode = #tpu.pipeline_mode<synchronous>, transform_indices = @transform_6, window_bounds = array<i64: 1, 1>}, {transform_indices = @transform_7, window_bounds = array<i64: 1, 1, 128>}]} {
    %c0 = arith.constant 0 : index
    %c0_0 = arith.constant 0 : index
    %0 = vector.load %arg1[%c0, %c0_0] : memref<10x128xbf16, #tpu.memory_space<vmem>>, vector<10x128xbf16>
    %c0_1 = arith.constant 0 : index
    %c0_2 = arith.constant 0 : index
    %1 = vector.load %arg2[%c0_1, %c0_2] : memref<64x10xbf16, #tpu.memory_space<vmem>>, vector<64x10xbf16>
    %cst = arith.constant dense<0.000000e+00> : vector<64x128xf32>
    %2 = tpu.matmul %1, %0, %cst {dimension_numbers = #tpu.dot_dimension_numbers<[1], [0], [0], [1], [0, 0, 1, 1], [], []>} : vector<64x10xbf16>, vector<10x128xbf16>, vector<64x128xf32> -> vector<64x128xf32>
    %c0_3 = arith.constant 0 : index
    %c0_4 = arith.constant 0 : index
    %3 = vector.load %arg3[%c0_3, %c0_4] : memref<64x1xf32, #tpu.memory_space<vmem>>, vector<64x1xf32>
    %4 = vector.broadcast %3 : vector<64x1xf32> to vector<64x128xf32>
    %5 = arith.addf %2, %4 : vector<64x128xf32>
    %cst_5 = arith.constant 0.000000e+00 : f32
    %6 = vector.broadcast %cst_5 : f32 to vector<64x128xf32>
    %7 = arith.maximumf %5, %6 : vector<64x128xf32>
    %c0_6 = arith.constant 0 : index
    %c0_7 = arith.constant 0 : index
    %c0_8 = arith.constant 0 : index
    %8 = vector.load %arg4[%c0_6, %c0_7, %c0_8] : memref<3x64x64xbf16, #tpu.memory_space<vmem>>, vector<1x64x64xbf16>
    %9 = vector.shape_cast %8 : vector<1x64x64xbf16> to vector<64x64xbf16>
    %10 = arith.truncf %7 : vector<64x128xf32> to vector<64x128xbf16>
    %cst_9 = arith.constant dense<0.000000e+00> : vector<64x128xf32>
    %11 = tpu.matmul %9, %10, %cst_9 {dimension_numbers = #tpu.dot_dimension_numbers<[1], [0], [0], [1], [0, 0, 1, 1], [], []>} : vector<64x64xbf16>, vector<64x128xbf16>, vector<64x128xf32> -> vector<64x128xf32>
    %c0_10 = arith.constant 0 : index
    %c0_11 = arith.constant 0 : index
    %c0_12 = arith.constant 0 : index
    %12 = vector.load %arg5[%c0_10, %c0_11, %c0_12] : memref<3x64x1xf32, #tpu.memory_space<vmem>>, vector<1x64x1xf32>
    %13 = vector.shape_cast %12 : vector<1x64x1xf32> to vector<64x1xf32>
    %14 = vector.broadcast %13 : vector<64x1xf32> to vector<64x128xf32>
    %15 = arith.addf %11, %14 : vector<64x128xf32>
    %cst_13 = arith.constant 0.000000e+00 : f32
    %16 = vector.broadcast %cst_13 : f32 to vector<64x128xf32>
    %17 = arith.maximumf %15, %16 : vector<64x128xf32>
    %c1 = arith.constant 1 : index
    %c0_14 = arith.constant 0 : index
    %c0_15 = arith.constant 0 : index
    %18 = vector.load %arg4[%c1, %c0_14, %c0_15] : memref<3x64x64xbf16, #tpu.memory_space<vmem>>, vector<1x64x64xbf16>
    %19 = vector.shape_cast %18 : vector<1x64x64xbf16> to vector<64x64xbf16>
    %20 = arith.truncf %17 : vector<64x128xf32> to vector<64x128xbf16>
    %cst_16 = arith.constant dense<0.000000e+00> : vector<64x128xf32>
    %21 = tpu.matmul %19, %20, %cst_16 {dimension_numbers = #tpu.dot_dimension_numbers<[1], [0], [0], [1], [0, 0, 1, 1], [], []>} : vector<64x64xbf16>, vector<64x128xbf16>, vector<64x128xf32> -> vector<64x128xf32>
    %c1_17 = arith.constant 1 : index
    %c0_18 = arith.constant 0 : index
    %c0_19 = arith.constant 0 : index
    %22 = vector.load %arg5[%c1_17, %c0_18, %c0_19] : memref<3x64x1xf32, #tpu.memory_space<vmem>>, vector<1x64x1xf32>
    %23 = vector.shape_cast %22 : vector<1x64x1xf32> to vector<64x1xf32>
    %24 = vector.broadcast %23 : vector<64x1xf32> to vector<64x128xf32>
    %25 = arith.addf %21, %24 : vector<64x128xf32>
    %cst_20 = arith.constant 0.000000e+00 : f32
    %26 = vector.broadcast %cst_20 : f32 to vector<64x128xf32>
    %27 = arith.maximumf %25, %26 : vector<64x128xf32>
    %c2 = arith.constant 2 : index
    %c0_21 = arith.constant 0 : index
    %c0_22 = arith.constant 0 : index
    %28 = vector.load %arg4[%c2, %c0_21, %c0_22] : memref<3x64x64xbf16, #tpu.memory_space<vmem>>, vector<1x64x64xbf16>
    %29 = vector.shape_cast %28 : vector<1x64x64xbf16> to vector<64x64xbf16>
    %30 = arith.truncf %27 : vector<64x128xf32> to vector<64x128xbf16>
    %cst_23 = arith.constant dense<0.000000e+00> : vector<64x128xf32>
    %31 = tpu.matmul %29, %30, %cst_23 {dimension_numbers = #tpu.dot_dimension_numbers<[1], [0], [0], [1], [0, 0, 1, 1], [], []>} : vector<64x64xbf16>, vector<64x128xbf16>, vector<64x128xf32> -> vector<64x128xf32>
    %c2_24 = arith.constant 2 : index
    %c0_25 = arith.constant 0 : index
    %c0_26 = arith.constant 0 : index
    %32 = vector.load %arg5[%c2_24, %c0_25, %c0_26] : memref<3x64x1xf32, #tpu.memory_space<vmem>>, vector<1x64x1xf32>
    %33 = vector.shape_cast %32 : vector<1x64x1xf32> to vector<64x1xf32>
    %34 = vector.broadcast %33 : vector<64x1xf32> to vector<64x128xf32>
    %35 = arith.addf %31, %34 : vector<64x128xf32>
    %cst_27 = arith.constant 0.000000e+00 : f32
    %36 = vector.broadcast %cst_27 : f32 to vector<64x128xf32>
    %37 = arith.maximumf %35, %36 : vector<64x128xf32>
    %c0_28 = arith.constant 0 : index
    %c0_29 = arith.constant 0 : index
    %38 = vector.load %arg6[%c0_28, %c0_29] : memref<64x1xf32, #tpu.memory_space<vmem>>, vector<64x1xf32>
    %39 = vector.broadcast %38 : vector<64x1xf32> to vector<64x128xf32>
    %40 = arith.mulf %39, %37 : vector<64x128xf32>
    %cst_30 = arith.constant dense<0.000000e+00> : vector<128xf32>
    %41 = vector.multi_reduction <add>, %40, %cst_30 [0] : vector<64x128xf32> to vector<128xf32>
    %42 = vector.shape_cast %41 : vector<128xf32> to vector<1x128xf32>
    %c0_31 = arith.constant 0 : index
    %c0_32 = arith.constant 0 : index
    %43 = vector.load %arg7[%c0_31, %c0_32] : memref<1x1xf32, #tpu.memory_space<vmem>>, vector<1x1xf32>
    %44 = vector.broadcast %43 : vector<1x1xf32> to vector<1x128xf32>
    %45 = arith.addf %42, %44 : vector<1x128xf32>
    %46 = vector.shape_cast %45 : vector<1x128xf32> to vector<1x1x128xf32>
    %c0_33 = arith.constant 0 : index
    %c0_34 = arith.constant 0 : index
    %c0_35 = arith.constant 0 : index
    %47 = vector.load %arg8[%c0_33, %c0_34, %c0_35] : memref<1x1x128xf32, #tpu.memory_space<vmem>>, vector<1x1x128xf32>
    tpu.vector_store %arg8[%c0_33, %c0_34, %c0_35], %46 {strides = array<i32>} : memref<1x1x128xf32, #tpu.memory_space<vmem>>, vector<1x1x128xf32>,
    return
  }
  func.func @transform_0(%arg0: i32) -> (i32, i32) {
    %c0_i32 = arith.constant 0 : i32
    %c0_i32_0 = arith.constant 0 : i32
    return %c0_i32, %arg0 : i32, i32
  }
  func.func @transform_1(%arg0: i32) -> (i32, i32) {
    %c0_i32 = arith.constant 0 : i32
    %c0_i32_0 = arith.constant 0 : i32
    %c0_i32_1 = arith.constant 0 : i32
    return %c0_i32, %c0_i32_0 : i32, i32
  }
  func.func @transform_2(%arg0: i32) -> (i32, i32) {
    %c0_i32 = arith.constant 0 : i32
    %c0_i32_0 = arith.constant 0 : i32
    %c0_i32_1 = arith.constant 0 : i32
    return %c0_i32, %c0_i32_0 : i32, i32
  }
  func.func @transform_3(%arg0: i32) -> (i32, i32, i32) {
    %c0_i32 = arith.constant 0 : i32
    %c0_i32_0 = arith.constant 0 : i32
    %c0_i32_1 = arith.constant 0 : i32
    %c0_i32_2 = arith.constant 0 : i32
    return %c0_i32, %c0_i32_0, %c0_i32_1 : i32, i32, i32
  }
  func.func @transform_4(%arg0: i32) -> (i32, i32, i32) {
    %c0_i32 = arith.constant 0 : i32
    %c0_i32_0 = arith.constant 0 : i32
    %c0_i32_1 = arith.constant 0 : i32
    %c0_i32_2 = arith.constant 0 : i32
    return %c0_i32, %c0_i32_0, %c0_i32_1 : i32, i32, i32
  }
  func.func @transform_5(%arg0: i32) -> (i32, i32) {
    %c0_i32 = arith.constant 0 : i32
    %c0_i32_0 = arith.constant 0 : i32
    %c0_i32_1 = arith.constant 0 : i32
    return %c0_i32, %c0_i32_0 : i32, i32
  }
  func.func @transform_6(%arg0: i32) -> (i32, i32) {
    %c0_i32 = arith.constant 0 : i32
    %c0_i32_0 = arith.constant 0 : i32
    %c0_i32_1 = arith.constant 0 : i32
    return %c0_i32, %c0_i32_0 : i32, i32
  }
  func.func @transform_7(%arg0: i32) -> (i32, i32, i32) {
    %c0_i32 = arith.constant 0 : i32
    %c0_i32_0 = arith.constant 0 : i32
    %c0_i32_1 = arith.constant 0 : i32
    return %arg0, %c0_i32, %c0_i32_0 : i32, i32, i32
  }
}

</mosaic_0001>

<bundles_post_ra>
// kernel: _lambda_.1
= control target key start
LH: loop header
LB: loop body
LE: loop exit
PB: predicated region body
PF: predicated region fallthrough
CT: control target
= control target key end

     0   :  { %s1022_s0 = inlined_call_operand.vmem [shape: bf16[10,128], index: 0, kind: input, shape index: {}]   ;;  %s1023_s1 = inlined_call_operand.vmem [shape: bf16[64,10], index: 1, kind: input, shape index: {}]   ;;  %s1024_s2 = inlined_call_operand.hbm [shape: f32[64,1], index: 2, kind: input, shape index: {}]   ;;  %s1025_s3 = inlined_call_operand.hbm [shape: bf16[3,64,64], index: 3, kind: input, shape index: {}]   ;;  %s1026_s4 = inlined_call_operand.hbm [shape: f32[3,64,1], index: 4, kind: input, shape index: {}]   ;;  %s1027_s5 = inlined_call_operand.hbm [shape: f32[64,1], index: 5, kind: input, shape index: {}]   ;;  %s1028_s6 = inlined_call_operand.<no memory space> [shape: f32[1,1], index: 6, kind: input, shape index: {}]   ;;  %s1029_s7 = inlined_call_operand.vmem [shape: f32[1,1,128], index: 7, kind: output, shape index: {}]  }
   0x1   :  { %v12_v0 = vstv %s1028_s6 }
   0x2   :  { %13 = vst [vmem:[#allocation2] sm:$0x1] %v12_v0 }
   0x3   :  { %14 = vsyncpa [#allocation4], 0 }
   0x4   :  { %15 = vsyncpa [#allocation6], 0  ;;  %s38_s28 = sshll.u32 %s1025_s3, 4  ;;  %s39_s28 = int_to_ptr.hbm [resolvable:$true] %s38_s28 }
   0x5   :  { %16 = vsyncpa [#allocation9], 0  ;;  %s921_s29 = smov [#allocation5]   ;;  %s25_s10 = sshll.u32 %s1024_s2, 4  ;;  %s26_s10 = int_to_ptr.hbm [resolvable:$true] %s25_s10 }
   0x6   :  { %s40_s30 = sshll.u32 %s921_s29, 4  ;;  %s922_s11 = smov 64   ;;  %s41_s30 = int_to_ptr.vmem [resolvable:$true] %s40_s30 }
   0x7   :  { %s923_s12 = smov 4   ;;  %s924_s6 = smov [#allocation3]  }
   0x8   :  { %46 = dma.hbm_to_vmem [thread:$0]  %s39_s28, 1536, %s41_s30, [#allocation6], %s922_s11, %s922_s11, %s923_s12  }
   0x9   :  { %s27_s13 = sshll.u32 %s924_s6, 4  ;;  %s925_s14 = smov 128   ;;  %s28_s13 = int_to_ptr.vmem [resolvable:$true] %s27_s13 }
   0xa   :  { %s926_s15 = smov 8   ;;  %s51_s17 = sshll.u32 %s1026_s4, 4  ;;  %s52_s17 = int_to_ptr.hbm [resolvable:$true] %s51_s17 }
   0xb   :  { %33 = dma.hbm_to_vmem [thread:$0]  %s26_s10, 1024, %s28_s13, [#allocation4], %s925_s14, %s925_s14, %s926_s15  }
   0xc   :  { %s927_s18 = smov [#allocation7]   ;;  %s64_s21 = sshll.u32 %s1027_s5, 4  ;;  %s65_s21 = int_to_ptr.hbm [resolvable:$true] %s64_s21 }
   0xd   :  { %s53_s19 = sshll.u32 %s927_s18, 4  ;;  %s928_s22 = smov [#allocation8]   ;;  %s54_s19 = int_to_ptr.vmem [resolvable:$true] %s53_s19 }
   0xe   :  { %59 = dma.hbm_to_vmem [thread:$0]  %s52_s17, 3072, %s54_s19, [#allocation6], %s925_s14, %s925_s14, %s926_s15  }
   0xf   :  { %s66_s23 = sshll.u32 %s928_s22, 4  ;;  %s67_s23 = int_to_ptr.vmem [resolvable:$true] %s66_s23 }
  0x10   :  { %72 = dma.hbm_to_vmem [thread:$0]  %s65_s21, 1024, %s67_s23, [#allocation9], %s925_s14, %s925_s14, %s926_s15  }
  0x11   :  { %915 = dma.done.wait [#allocation4], 1024  }
  0x12   :  { %916 = vsyncadd [#allocation4], 4294966272 }
  0x13   :  { %917 = dma.done.wait [#allocation6], 4608  }
  0x14   :  { %918 = vsyncadd [#allocation6], 4294962688 }
  0x15   :  { %919 = dma.done.wait [#allocation9], 1024  }
  0x16   :  { %920 = vsyncadd [#allocation9], 4294966272  ;;  %v929_v1 = vmov 0   ;;  %v108_v2 = vld [vmem:[#allocation3 + $0x30] sm:$0xff]  ;;  %v106_v3 = vld [vmem:[#allocation3 + $0x20] sm:$0xff]  ;;  %vm188_vm0 = vcmask 1044480  }
  0x17   :  { %817 = vset.pattern.permute.xlu1 %v929_v1  ;;  %816 = vset.pattern.permute.xlu0 %v929_v1  ;;  %v104_v4 = vld [vmem:[#allocation3 + $0x10] sm:$0xff]  ;;  %v724_v5 = vld [vmem:[%s1022_s0] sm:$0xf]  ;;  %v790_v6 = vld [vmem:[%s1022_s0] sm:$0x10]  ;;  %vm175_vm1 = vcmask 80896  }
  0x18   :  { %818 = vset.pattern.permute.xlu2 %v929_v1  ;;  %142 = vperm.xlu0 %816, %v108_v2   ;;  %v725_v7 = vor.u32 %v790_v6, %v724_v5  ;;  %v791_v9 = vld [vmem:[%s1023_s1] sm:$0xff]  ;;  %v107_v11 = vld [vmem:[#allocation3 + $0x28] sm:$0xff]  ;;  %v247_v15 = vld [vmem:[#allocation7 + $0x30] sm:$0xff]  ;;  %vm309_vm2 = vcmask 523264  }
  0x19   :  { %132 = vperm.xlu1 %817, %v106_v3   ;;  %122 = vperm.xlu2 %818, %v104_v4   ;;  %v109_v10 = vld [vmem:[#allocation3 + $0x38] sm:$0xff]  ;;  %v103_v13 = vld [vmem:[#allocation3 + $0x8] sm:$0xff]  ;;  %v102_v14 = vld [vmem:[#allocation3] sm:$0xff] }
  0x1a   :  { %v190_v8 = vsel %vm188_vm0, %v725_v7, 0  ;;  %v105_v12 = vld [vmem:[#allocation3 + $0x18] sm:$0xff]  ;;  %v792_v16 = vld [vmem:[%s1023_s1 + $0x8] sm:$0xff]  ;;  %v243_v21 = vld [vmem:[#allocation7 + $0x10] sm:$0xff] }
  0x1b   :  { %199 = vmatpush.bf16.msra.mxu0 %v190_v8  ;;  %v245_v17 = vld [vmem:[#allocation7 + $0x20] sm:$0xff]  ;;  %v248_v18 = vld [vmem:[#allocation7 + $0x38] sm:$0xff]  ;;  %v246_v19 = vld [vmem:[#allocation7 + $0x28] sm:$0xff] }
  0x1c   :  { %v244_v20 = vld [vmem:[#allocation7 + $0x18] sm:$0xff]  ;;  %v241_v22 = vld [vmem:[#allocation7] sm:$0xff]  ;;  %v793_v23 = vld [vmem:[%s1023_s1 + $0x10] sm:$0xff] }
  0x1d   :  { %v379_v24 = vld [vmem:[#allocation7 + $0x70] sm:$0xff]  ;;  %v242_v25 = vld [vmem:[#allocation7 + $0x8] sm:$0xff]  ;;  %v380_v26 = vld [vmem:[#allocation7 + $0x78] sm:$0xff] }
  0x1e   :  { %726 = vmatmul.msk.bf16.vlgmr.msra.gmra.mxu0 %vm175_vm1, %v791_v9  ;;  %v378_v27 = vld [vmem:[#allocation7 + $0x68] sm:$0xff]  ;;  %v377_v28 = vld [vmem:[#allocation7 + $0x60] sm:$0xff]  ;;  %v375_v29 = vld [vmem:[#allocation7 + $0x50] sm:$0xff] }
  0x1f   :  { %v794_v30 = vld [vmem:[%s1023_s1 + $0x18] sm:$0xff]  ;;  %v373_v31 = vld [vmem:[#allocation7 + $0x40] sm:$0xff]  ;;  %v374_v33 = vld [vmem:[#allocation7 + $0x48] sm:$0xff] }
  0x20   :  { %147 = vperm.xlu0 %816, %v109_v10   ;;  %v376_v32 = vld [vmem:[#allocation7 + $0x58] sm:$0xff]  ;;  %v505_v34 = vld [vmem:[#allocation7 + $0x88] sm:$0xff]  ;;  %v504_v35 = vld [vmem:[#allocation7 + $0x80] sm:$0xff] }
  0x21   :  { %137 = vperm.xlu1 %817, %v107_v11   ;;  %127 = vperm.xlu2 %818, %v105_v12   ;;  %v506_v36 = vld [vmem:[#allocation7 + $0x90] sm:$0xff]  ;;  %v508_v37 = vld [vmem:[#allocation7 + $0xa0] sm:$0xff]  ;;  %v507_v38 = vld [vmem:[#allocation7 + $0x98] sm:$0xff] }
  0x22   :  { %v509_v39 = vld [vmem:[#allocation7 + $0xa8] sm:$0xff]  ;;  %v621_v41 = vld [vmem:[#allocation8] sm:$0xff]  ;;  %v623_v42 = vld [vmem:[#allocation8 + $0x10] sm:$0xff] }
  0x23   :  { %v622_v40 = vld [vmem:[#allocation8 + $0x8] sm:$0xff]  ;;  %v510_v43 = vld [vmem:[#allocation7 + $0xb0] sm:$0xff]  ;;  %v624_v44 = vld [vmem:[#allocation8 + $0x18] sm:$0xff] }
  0x24   :  { %v625_v45 = vld [vmem:[#allocation8 + $0x20] sm:$0xff]  ;;  %v626_v46 = vld [vmem:[#allocation8 + $0x28] sm:$0xff]  ;;  %v511_v47 = vld [vmem:[#allocation7 + $0xb8] sm:$0xff] }
  0x25   :  { %v627_v48 = vld [vmem:[#allocation8 + $0x30] sm:$0xff]  ;;  %v690_v49 = vld [vmem:[#allocation2] sm:$0x1] }
  0x26   :  { %v628_v50 = vld [vmem:[#allocation8 + $0x38] sm:$0xff] }
  0x28   :  { %112 = vperm.xlu0 %816, %v102_v14  }
  0x29   :  { %117 = vperm.xlu1 %817, %v103_v13   ;;  %281 = vperm.xlu2 %818, %v247_v15  }
  0x2e   :  { %727 = vmatmul.msk.bf16.gmra.mxu0 %vm175_vm1, %v792_v16 }
  0x30   :  { %286 = vperm.xlu0 %816, %v248_v18  }
  0x31   :  { %271 = vperm.xlu1 %817, %v245_v17   ;;  %276 = vperm.xlu2 %818, %v246_v19  }
  0x38   :  { %261 = vperm.xlu0 %816, %v243_v21  }
  0x39   :  { %266 = vperm.xlu1 %817, %v244_v20   ;;  %251 = vperm.xlu2 %818, %v241_v22  }
  0x3e   :  { %728 = vmatmul.msk.bf16.gmra.mxu0 %vm175_vm1, %v793_v23  ;;  %v795_v23 = vld [vmem:[#allocation5] sm:$0xff] }
  0x40   :  { %256 = vperm.xlu0 %816, %v242_v25   ;;  %v797_v25 = vld [vmem:[#allocation5 + $0x10] sm:$0xff] }
  0x41   :  { %413 = vperm.xlu1 %817, %v379_v24   ;;  %418 = vperm.xlu2 %818, %v380_v26   ;;  %v796_v24 = vld [vmem:[#allocation5 + $0x8] sm:$0xff]  ;;  %v798_v26 = vld [vmem:[#allocation5 + $0x18] sm:$0xff] }
  0x48   :  { %403 = vperm.xlu0 %816, %v377_v28  }
  0x49   :  { %408 = vperm.xlu1 %817, %v378_v27   ;;  %393 = vperm.xlu2 %818, %v375_v29  }
  0x4e   :  { %729 = vmatmul.msk.bf16.gmra.mxu0 %vm175_vm1, %v794_v30 }
  0x50   :  { %398 = vperm.xlu0 %816, %v376_v32  }
  0x51   :  { %383 = vperm.xlu1 %817, %v373_v31   ;;  %388 = vperm.xlu2 %818, %v374_v33  }
  0x58   :  { %514 = vperm.xlu0 %816, %v504_v35  }
  0x59   :  { %519 = vperm.xlu1 %817, %v505_v34   ;;  %524 = vperm.xlu2 %818, %v506_v36  }
  0x60   :  { %529 = vperm.xlu0 %816, %v507_v38  }
  0x61   :  { %534 = vperm.xlu1 %817, %v508_v37   ;;  %539 = vperm.xlu2 %818, %v509_v39  }
  0x68   :  { %631 = vperm.xlu0 %816, %v621_v41  }
  0x69   :  { %636 = vperm.xlu1 %817, %v622_v40   ;;  %641 = vperm.xlu2 %818, %v623_v42  }
  0x70   :  { %646 = vperm.xlu0 %816, %v624_v44  }
  0x71   :  { %544 = vperm.xlu1 %817, %v510_v43   ;;  %651 = vperm.xlu2 %818, %v625_v45  }
  0x73   :  { %v123_v60 = vpop.permute.xlu2 %122 }
  0x78   :  { %549 = vperm.xlu0 %816, %v511_v47  }
  0x79   :  { %656 = vperm.xlu1 %817, %v626_v46   ;;  %661 = vperm.xlu2 %818, %v627_v48  }
  0x7b   :  { %v128_v6 = vpop.permute.xlu2 %127 }
  0x80   :  { %666 = vperm.xlu0 %816, %v628_v50  }
  0x81   :  { %693 = vperm.xlu1 %817, %v690_v49  }
  0x83   :  { %v282_v34 = vpop.permute.xlu2 %281 }
  0x8a   :  { %v143_v57 = vpop.permute.xlu0 %142 }
  0x8b   :  { %v133_v58 = vpop.permute.xlu1 %132  ;;  %v277_v39 = vpop.permute.xlu2 %276 }
  0x92   :  { %v148_v61 = vpop.permute.xlu0 %147 }
  0x93   :  { %v138_v62 = vpop.permute.xlu1 %137 }
  0x9a   :  { %v113_v13 = vpop.permute.xlu0 %112 }
  0x9b   :  { %v201_v51 = vpop.f32.mrf.mxu0  ;;  %v118_v12 = vpop.permute.xlu1 %117 }
  0x9c   :  { %v202_v17 = vadd.f32 %v201_v51, %v113_v13 }
  0x9e   :  { %v221_v21 = vmax.f32 %v202_v17, 0.0 }
  0xa2   :  { %v287_v33 = vpop.permute.xlu0 %286 }
  0xa3   :  { %v203_v52 = vpop.f32.mrf.mxu0  ;;  %v272_v36 = vpop.permute.xlu1 %271 }
  0xa4   :  { %v204_v14 = vadd.f32 %v203_v52, %v118_v12 }
  0xa6   :  { %v222_v19 = vmax.f32 %v204_v14, 0.0 }
  0xa8   :  { %v237_v22 = vpack.c.bf16 %v222_v19, %v221_v21 }
  0xaa   :  { %v262_v37 = vpop.permute.xlu0 %261 }
  0xab   :  { %v206_v53 = vpop.f32.mrf.mxu0  ;;  %v267_v46 = vpop.permute.xlu1 %266 }
  0xac   :  { %v207_v10 = vadd.f32 %v206_v53, %v123_v60 }
  0xae   :  { %v223_v18 = vmax.f32 %v207_v10, 0.0 }
  0xb2   :  { %v257_v52 = vpop.permute.xlu0 %256 }
  0xb3   :  { %v208_v54 = vpop.f32.mrf.mxu0  ;;  %v414_v10 = vpop.permute.xlu1 %413 }
  0xb4   :  { %v209_v7 = vadd.f32 %v208_v54, %v128_v6 }
  0xb6   :  { %v224_v15 = vmax.f32 %v209_v7, 0.0 }
  0xb8   :  { %v238_v20 = vpack.c.bf16 %v224_v15, %v223_v18 }
  0xba   :  { %v404_v12 = vpop.permute.xlu0 %403 }
  0xbb   :  { %v211_v55 = vpop.f32.mrf.mxu0  ;;  %v409_v15 = vpop.permute.xlu1 %408 }
  0xbc   :  { %v212_v3 = vadd.f32 %v211_v55, %v133_v58 }
  0xbe   :  { %v225_v11 = vmax.f32 %v212_v3, 0.0 }
  0xc3   :  { %v213_v56 = vpop.f32.mrf.mxu0 }
  0xc4   :  { %v214_v1 = vadd.f32 %v213_v56, %v138_v62  ;;  %v252_v56 = vpop.permute.xlu2 %251 }
  0xc6   :  { %v226_v8 = vmax.f32 %v214_v1, 0.0  ;;  %v801_v1 = vld [vmem:[#allocation5 + $0x30] sm:$0xff] }
  0xc8   :  { %v239_v16 = vpack.c.bf16 %v226_v8, %v225_v11 }
  0xcb   :  { %v216_v59 = vpop.f32.mrf.mxu0 }
  0xcc   :  { %v217_v63 = vadd.f32 %v216_v59, %v143_v57 }
  0xce   :  { %v227_v4 = vmax.f32 %v217_v63, 0.0  ;;  %v799_v63 = vld [vmem:[#allocation5 + $0x20] sm:$0xff] }
  0xd3   :  { %v218_v0 = vpop.f32.mrf.mxu0 }
  0xd4   :  { %v219_v2 = vadd.f32 %v218_v0, %v148_v61  ;;  %v800_v0 = vld [vmem:[#allocation5 + $0x28] sm:$0xff] }
  0xd6   :  { %v228_v5 = vmax.f32 %v219_v2, 0.0  ;;  %v802_v2 = vld [vmem:[#allocation5 + $0x38] sm:$0xff] }
  0xd8   :  { %v240_v9 = vpack.c.bf16 %v228_v5, %v227_v4 }
  0xda   :  { %326 = vmatpush.bf16.msra.mxu1 %v240_v9  ;;  %v419_v9 = vpop.permute.xlu2 %418 }
  0xde   :  { %327 = vmatpush.bf16.msra.mxu1 %v239_v16 }
  0xe2   :  { %328 = vmatpush.bf16.msra.mxu1 %v238_v20  ;;  %v394_v13 = vpop.permute.xlu2 %393 }
  0xe6   :  { %329 = vmatpush.bf16.msra.mxu1 %v237_v22  ;;  %v399_v22 = vpop.permute.xlu0 %398 }
  0xe9   :  { %746 = vmatmul.msk.bf16.vlgmr.msra.gmra.mxu1 %vm309_vm2, %v795_v23 }
  0xf9   :  { %747 = vmatmul.msk.bf16.gmra.mxu1 %vm309_vm2, %v796_v24 }
 0x109   :  { %748 = vmatmul.msk.bf16.gmra.mxu1 %vm309_vm2, %v797_v25 }
 0x119   :  { %749 = vmatmul.msk.bf16.gmra.mxu1 %vm309_vm2, %v798_v26 }
 0x166   :  { %v331_v27 = vpop.f32.mrf.mxu1 }
 0x167   :  { %v332_v57 = vadd.f32 %v331_v27, %v252_v56 }
 0x169   :  { %v351_v61 = vmax.f32 %v332_v57, 0.0 }
 0x16e   :  { %v333_v28 = vpop.f32.mrf.mxu1 }
 0x16f   :  { %v334_v53 = vadd.f32 %v333_v28, %v257_v52  ;;  %v389_v28 = vpop.permute.xlu2 %388 }
 0x171   :  { %v352_v59 = vmax.f32 %v334_v53, 0.0 }
 0x173   :  { %v368_v62 = vpack.c.bf16 %v352_v59, %v351_v61 }
 0x176   :  { %v336_v29 = vpop.f32.mrf.mxu1 }
 0x177   :  { %v337_v50 = vadd.f32 %v336_v29, %v262_v37 }
 0x179   :  { %v353_v58 = vmax.f32 %v337_v50, 0.0 }
 0x17e   :  { %v338_v30 = vpop.f32.mrf.mxu1 }
 0x17f   :  { %v339_v47 = vadd.f32 %v338_v30, %v267_v46 }
 0x181   :  { %v354_v54 = vmax.f32 %v339_v47, 0.0  ;;  %v525_v47 = vpop.permute.xlu2 %524 }
 0x183   :  { %v369_v60 = vpack.c.bf16 %v354_v54, %v353_v58 }
 0x186   :  { %v341_v31 = vpop.f32.mrf.mxu1 }
 0x187   :  { %v342_v43 = vadd.f32 %v341_v31, %v272_v36 }
 0x189   :  { %v355_v51 = vmax.f32 %v342_v43, 0.0  ;;  %v540_v52 = vpop.permute.xlu2 %539 }
 0x18e   :  { %v343_v32 = vpop.f32.mrf.mxu1 }
 0x18f   :  { %v344_v41 = vadd.f32 %v343_v32, %v277_v39  ;;  %v384_v32 = vpop.permute.xlu1 %383  ;;  %v803_v39 = vld [vmem:[#allocation5 + $0x40] sm:$0xff] }
 0x191   :  { %v356_v48 = vmax.f32 %v344_v41, 0.0  ;;  %v805_v41 = vld [vmem:[#allocation5 + $0x50] sm:$0xff]  ;;  %v642_v56 = vpop.permute.xlu2 %641 }
 0x193   :  { %v370_v55 = vpack.c.bf16 %v356_v48, %v355_v51 }
 0x196   :  { %v346_v35 = vpop.f32.mrf.mxu1 }
 0x197   :  { %v347_v38 = vadd.f32 %v346_v35, %v282_v34  ;;  %v520_v46 = vpop.permute.xlu1 %519 }
 0x199   :  { %v357_v44 = vmax.f32 %v347_v38, 0.0 }
 0x19e   :  { %v348_v40 = vpop.f32.mrf.mxu1 }
 0x19f   :  { %v349_v42 = vadd.f32 %v348_v40, %v287_v33  ;;  %v804_v40 = vld [vmem:[#allocation5 + $0x48] sm:$0xff]  ;;  %v535_v50 = vpop.permute.xlu1 %534 }
 0x1a1   :  { %v358_v45 = vmax.f32 %v349_v42, 0.0  ;;  %v806_v42 = vld [vmem:[#allocation5 + $0x58] sm:$0xff] }
 0x1a3   :  { %v371_v49 = vpack.c.bf16 %v358_v45, %v357_v44  ;;  %v515_v45 = vpop.permute.xlu0 %514 }
 0x1a5   :  { %457 = vmatpush.bf16.msra.mxu2 %v371_v49 }
 0x1a9   :  { %458 = vmatpush.bf16.msra.mxu2 %v370_v55  ;;  %v637_v55 = vpop.permute.xlu1 %636 }
 0x1ab   :  { %v530_v49 = vpop.permute.xlu0 %529 }
 0x1ad   :  { %459 = vmatpush.bf16.msra.mxu2 %v369_v60 }
 0x1b1   :  { %460 = vmatpush.bf16.msra.mxu2 %v368_v62 }
 0x1b3   :  { %v632_v53 = vpop.permute.xlu0 %631 }
 0x1b4   :  { %766 = vmatmul.msk.bf16.vlgmr.msra.gmra.mxu2 %vm309_vm2, %v799_v63 }
 0x1bb   :  { %v647_v58 = vpop.permute.xlu0 %646 }
 0x1c4   :  { %767 = vmatmul.msk.bf16.gmra.mxu2 %vm309_vm2, %v800_v0  ;;  %v545_v0 = vpop.permute.xlu1 %544 }
 0x1d4   :  { %768 = vmatmul.msk.bf16.gmra.mxu2 %vm309_vm2, %v801_v1 }
 0x1e4   :  { %769 = vmatmul.msk.bf16.gmra.mxu2 %vm309_vm2, %v802_v2 }
 0x237   :  { %v462_v3 = vpop.f32.mrf.mxu2 }
 0x238   :  { %v463_v33 = vadd.f32 %v462_v3, %v384_v32 }
 0x23a   :  { %v482_v37 = vmax.f32 %v463_v33, 0.0 }
 0x23f   :  { %v464_v4 = vpop.f32.mrf.mxu2 }
 0x240   :  { %v465_v29 = vadd.f32 %v464_v4, %v389_v28  ;;  %v652_v4 = vpop.permute.xlu2 %651 }
 0x242   :  { %v483_v35 = vmax.f32 %v465_v29, 0.0 }
 0x244   :  { %v499_v38 = vpack.c.bf16 %v483_v35, %v482_v37 }
 0x247   :  { %v467_v5 = vpop.f32.mrf.mxu2 }
 0x248   :  { %v468_v26 = vadd.f32 %v467_v5, %v394_v13  ;;  %v550_v13 = vpop.permute.xlu0 %549 }
 0x24a   :  { %v484_v34 = vmax.f32 %v468_v26, 0.0 }
 0x24f   :  { %v469_v6 = vpop.f32.mrf.mxu2 }
 0x250   :  { %v470_v23 = vadd.f32 %v469_v6, %v399_v22 }
 0x252   :  { %v485_v30 = vmax.f32 %v470_v23, 0.0  ;;  %v662_v23 = vpop.permute.xlu2 %661 }
 0x254   :  { %v500_v36 = vpack.c.bf16 %v485_v30, %v484_v34  ;;  %v667_v30 = vpop.permute.xlu0 %666 }
 0x257   :  { %v472_v7 = vpop.f32.mrf.mxu2 }
 0x258   :  { %v473_v19 = vadd.f32 %v472_v7, %v404_v12 }
 0x25a   :  { %v486_v27 = vmax.f32 %v473_v19, 0.0 }
 0x25f   :  { %v474_v8 = vpop.f32.mrf.mxu2 }
 0x260   :  { %v475_v17 = vadd.f32 %v474_v8, %v409_v15 }
 0x262   :  { %v487_v24 = vmax.f32 %v475_v17, 0.0 }
 0x264   :  { %v501_v31 = vpack.c.bf16 %v487_v24, %v486_v27 }
 0x267   :  { %v477_v11 = vpop.f32.mrf.mxu2 }
 0x268   :  { %v478_v14 = vadd.f32 %v477_v11, %v414_v10 }
 0x26a   :  { %v488_v20 = vmax.f32 %v478_v14, 0.0 }
 0x26f   :  { %v479_v16 = vpop.f32.mrf.mxu2 }
 0x270   :  { %v480_v18 = vadd.f32 %v479_v16, %v419_v9 }
 0x272   :  { %v489_v21 = vmax.f32 %v480_v18, 0.0 }
 0x274   :  { %v502_v25 = vpack.c.bf16 %v489_v21, %v488_v20  ;;  %v657_v20 = vpop.permute.xlu1 %656 }
 0x276   :  { %588 = vmatpush.bf16.msra.mxu3 %v502_v25 }
 0x27a   :  { %589 = vmatpush.bf16.msra.mxu3 %v501_v31 }
 0x27e   :  { %590 = vmatpush.bf16.msra.mxu3 %v500_v36 }
 0x282   :  { %591 = vmatpush.bf16.msra.mxu3 %v499_v38  ;;  %v694_v38 = vpop.permute.xlu1 %693 }
 0x285   :  { %786 = vmatmul.msk.bf16.vlgmr.msra.gmra.mxu3 %vm309_vm2, %v803_v39 }
 0x295   :  { %787 = vmatmul.msk.bf16.gmra.mxu3 %vm309_vm2, %v804_v40  ;;  %v696_v40 = vperm.slane %v694_v38, 0 }
 0x2a5   :  { %788 = vmatmul.msk.bf16.gmra.mxu3 %vm309_vm2, %v805_v41 }
 0x2b5   :  { %789 = vmatmul.msk.bf16.gmra.mxu3 %vm309_vm2, %v806_v42 }
 0x308   :  { %v593_v43 = vpop.f32.mrf.mxu3 }
 0x309   :  { %v594_v60 = vadd.f32 %v593_v43, %v515_v45 }
 0x30b   :  { %v613_v1 = vmax.f32 %v594_v60, 0.0 }
 0x30d   :  { %v669_v9 = vmul.f32 %v632_v53, %v613_v1 }
 0x310   :  { %v595_v44 = vpop.f32.mrf.mxu3 }
 0x311   :  { %v596_v57 = vadd.f32 %v595_v44, %v520_v46 }
 0x313   :  { %v614_v62 = vmax.f32 %v596_v57, 0.0 }
 0x315   :  { %v670_v5 = vmul.f32 %v637_v55, %v614_v62 }
 0x317   :  { %v677_v14 = vadd.f32 %v670_v5, %v669_v9 }
 0x318   :  { %v598_v48 = vpop.f32.mrf.mxu3 }
 0x319   :  { %v599_v61 = vadd.f32 %v598_v48, %v525_v47 }
 0x31b   :  { %v615_v2 = vmax.f32 %v599_v61, 0.0 }
 0x31d   :  { %v671_v10 = vmul.f32 %v642_v56, %v615_v2 }
 0x31f   :  { %v678_v17 = vadd.f32 %v677_v14, %v671_v10 }
 0x320   :  { %v600_v51 = vpop.f32.mrf.mxu3 }
 0x321   :  { %v601_v63 = vadd.f32 %v600_v51, %v530_v49 }
 0x323   :  { %v616_v6 = vmax.f32 %v601_v63, 0.0 }
 0x325   :  { %v672_v15 = vmul.f32 %v647_v58, %v616_v6 }
 0x327   :  { %v679_v21 = vadd.f32 %v678_v17, %v672_v15 }
 0x328   :  { %v603_v54 = vpop.f32.mrf.mxu3 }
 0x329   :  { %v604_v3 = vadd.f32 %v603_v54, %v535_v50 }
 0x32b   :  { %v617_v11 = vmax.f32 %v604_v3, 0.0 }
 0x32d   :  { %v673_v18 = vmul.f32 %v652_v4, %v617_v11 }
 0x32f   :  { %v680_v25 = vadd.f32 %v679_v21, %v673_v18 }
 0x330   :  { %v605_v59 = vpop.f32.mrf.mxu3 }
 0x331   :  { %v606_v7 = vadd.f32 %v605_v59, %v540_v52 }
 0x333   :  { %v618_v16 = vmax.f32 %v606_v7, 0.0 }
 0x335   :  { %v674_v22 = vmul.f32 %v657_v20, %v618_v16 }
 0x337   :  { %v681_v28 = vadd.f32 %v680_v25, %v674_v22 }
 0x338   :  { %v608_v8 = vpop.f32.mrf.mxu3 }
 0x339   :  { %v609_v12 = vadd.f32 %v608_v8, %v545_v0 }
 0x33b   :  { %v619_v19 = vmax.f32 %v609_v12, 0.0 }
 0x33d   :  { %v675_v26 = vmul.f32 %v662_v23, %v619_v19 }
 0x33f   :  { %v682_v31 = vadd.f32 %v681_v28, %v675_v26 }
 0x340   :  { %v610_v24 = vpop.f32.mrf.mxu3 }
 0x341   :  { %v611_v27 = vadd.f32 %v610_v24, %v550_v13 }
 0x343   :  { %v620_v29 = vmax.f32 %v611_v27, 0.0 }
 0x345   :  { %v676_v32 = vmul.f32 %v667_v30, %v620_v29 }
 0x347   :  { %v683_v33 = vadd.f32 %v682_v31, %v676_v32 }
 0x349   :  { %v684_v34 = vrot.slane %v683_v33, 4 }
 0x34b   :  { %v685_v35 = vadd.f32 %v684_v34, %v683_v33 }
 0x34d   :  { %v686_v36 = vrot.slane %v685_v35, 2 }
 0x34f   :  { %v687_v37 = vadd.f32 %v686_v36, %v685_v35 }
 0x351   :  { %v688_v39 = vrot.slane %v687_v37, 1 }
 0x353   :  { %v689_v41 = vadd.f32 %v688_v39, %v687_v37 }
 0x355   :  { %v697_v42 = vadd.f32 %v696_v40, %v689_v41 }
 0x357   :  { %698 = vst [vmem:[%s1029_s7] sm:$0x1] %v697_v42 }
 0x358   :  { %703 = vsyncpa [#allocation4], 1 }
 0x359   :  { %704 = vsyncpa [#allocation6], 1 }
 0x35a   :  { %705 = vsyncpa [#allocation9], 1 }

</bundles_post_ra>
